<compile_context>
chip_gen: v5e
topology: v5e:2x2
jax: 0.10.0
libtpu: 0.0.40
codegen_flags: <defaults>
</compile_context>

<pallas_src>
import functools

import jax
import jax.numpy as jnp
from jax.experimental import pallas as pl
from jax.experimental.pallas import tpu as pltpu


# ----------------------------------------------------------------------------
# Kernel
# ----------------------------------------------------------------------------
def policy_net_kernel(x_ref, w1_ref, b1_ref, w2_ref, b2_ref, w3_ref, b3_ref,
                      out_ref, *, bf16_hidden):
    """One batch tile: softmax(relu(relu(x@W1+b1)@W2+b2)@W3+b3)."""
    x = x_ref[...].astype(jnp.bfloat16)

    # Layer 1: MXU matmul (f32 accumulation) + bias + ReLU.
    h1 = jnp.dot(x, w1_ref[...], preferred_element_type=jnp.float32)
    if bf16_hidden:
        # v6e/v7x: bf16 VPU -> fuse downcast + bias + ReLU in bf16 (halves
        # VALU element count and the live footprint of h1/h2).
        h1 = jnp.maximum(h1.astype(jnp.bfloat16)
                         + b1_ref[...].astype(jnp.bfloat16), 0.0)
    else:
        # v5e: no bf16 VPU -> elementwise in f32, downcast only for the MXU.
        h1 = jnp.maximum(h1 + b1_ref[...], 0.0).astype(jnp.bfloat16)

    # Layer 2.
    h2 = jnp.dot(h1, w2_ref[...], preferred_element_type=jnp.float32)
    if bf16_hidden:
        h2 = jnp.maximum(h2.astype(jnp.bfloat16)
                         + b2_ref[...].astype(jnp.bfloat16), 0.0)
    else:
        h2 = jnp.maximum(h2 + b2_ref[...], 0.0).astype(jnp.bfloat16)

    # Layer 3 + softmax, in f32.
    logits = jnp.dot(h2, w3_ref[...], preferred_element_type=jnp.float32)
    # b3 pad columns are -inf, so padded lanes contribute exp(-inf)=0 below.
    logits = logits + b3_ref[...]

    m = jnp.max(logits, axis=-1, keepdims=True)
    e = jnp.exp(logits - m)
    denom = jnp.sum(e, axis=-1, keepdims=True)
    # Exact division (EUP slot is otherwise idle): rows normalized to f32
    # precision before the final (bf16) store; pad lanes are exact 0.0.
    out_ref[...] = (e / denom).astype(out_ref.dtype)


# ----------------------------------------------------------------------------
# Host-side helpers
# ----------------------------------------------------------------------------
def _round_up(n, m):
    return ((n + m - 1) // m) * m


def _device_flags():
    """(use bf16 elementwise?, #TensorCores per chip) from the device kind."""
    try:
        kind = jax.devices()[0].device_kind.lower()
    except Exception:  # pragma: no cover - defensive
        kind = ""
    bf16_hidden = "v5" not in kind          # v5e has no bf16 VPU
    num_cores = 2 if "v7" in kind else 1    # v7x: 2 TCs/chip
    return bf16_hidden, num_cores


def prepare_params(params):
    """One-time weight prep (hoisted out of the per-call forward).

    bf16 MXU operands, last layer zero-padded to a 128-lane multiple, b3 pad
    columns set to -inf so the padded lanes vanish in the softmax.
    """
    w1, b1, w2, b2, w3, b3 = (params["w1"], params["b1"], params["w2"],
                              params["b2"], params["w3"], params["b3"])
    S, H = w1.shape
    A = w3.shape[1]
    AP = _round_up(A, 128)
    w3p = jnp.zeros((H, AP), w3.dtype).at[:, :A].set(w3)
    b3p = jnp.full((1, AP), -jnp.inf, jnp.float32).at[:, :A].set(
        b3.astype(jnp.float32))
    return dict(
        w1=w1.astype(jnp.bfloat16), b1=b1.astype(jnp.float32),
        w2=w2.astype(jnp.bfloat16), b2=b2.astype(jnp.float32),
        w3=w3p.astype(jnp.bfloat16), b3=b3p,
        state_dim=S, hidden=H, action_dim=A, action_dim_padded=AP)


def policy_net_discrete_forward(x, prepped, *, tm_max=1024,
                                out_dtype=jnp.bfloat16, return_padded=False):
    """x: [B, S] float32. prepped: output of prepare_params()."""
    S, H = prepped["state_dim"], prepped["hidden"]
    A, AP = prepped["action_dim"], prepped["action_dim_padded"]
    w1, b1, w2, b2, w3, b3 = (prepped["w1"], prepped["b1"], prepped["w2"],
                              prepped["b2"], prepped["w3"], prepped["b3"])
    B = x.shape[0]
    assert x.shape[1] == S

    bf16_hidden, num_cores = _device_flags()
    kernel = functools.partial(policy_net_kernel, bf16_hidden=bf16_hidden)

    # --- batch tiling ---------------------------------------------------------
    Bp8 = _round_up(B, 8)
    # Grid-less single-tile path only when splitting buys nothing: up to tm_max
    # rows on single-TC chips, but only small batches on v7x (keep both cores
    # busy for anything mid-sized).
    grid_less_max = tm_max if num_cores == 1 else 256
    if Bp8 <= grid_less_max:
        nb, tm, Bp = 1, Bp8, Bp8
    else:
        # Balanced tiling: nb ~equal tiles (multiple of #cores on v7x) instead
        # of rounding B up to a multiple of tm_max.
        nb = max(-(-Bp8 // tm_max), num_cores)
        nb = _round_up(nb, num_cores)
        tm = _round_up(-(-Bp8 // nb), 16)   # 16: bf16-output sublane packing
        Bp = nb * tm

    if Bp != B:
        x = jnp.zeros((Bp, S), x.dtype).at[:B, :].set(x)

    out_bytes = jnp.dtype(out_dtype).itemsize
    cost = pl.CostEstimate(
        flops=2 * Bp * (S * H + H * H + H * AP),
        transcendentals=Bp * (AP + 1),
        bytes_accessed=(Bp * S * 4 + (S * H + H * H + H * AP) * 2
                        + (2 * H + AP) * 4 + Bp * AP * out_bytes),
    )
    out_shape = jax.ShapeDtypeStruct((Bp, AP), out_dtype)
    args = (x, w1, b1, w2, b2, w3, b3)

    if nb == 1:
        # Whole problem in one tile: grid-less call, everything VMEM-resident,
        # no per-step pipelining overhead.
        vmem = pl.BlockSpec(memory_space=pltpu.MemorySpace.VMEM)
        out = pl.pallas_call(
            kernel,
            out_shape=out_shape,
            in_specs=[vmem] * 7,
            out_specs=vmem,
            compiler_params=pltpu.CompilerParams(
                vmem_limit_bytes=32 * 1024 * 1024),
            cost_estimate=cost,
        )(*args)
    else:
        # Tile over the batch; weights/biases have a constant index_map so they
        # stay VMEM-resident across grid steps; batch axis is "parallel"
        # (megacore/TC sharding where available).
        const = lambda shape: pl.BlockSpec(shape, lambda i: (0,) * len(shape))
        out = pl.pallas_call(
            kernel,
            out_shape=out_shape,
            grid=(nb,),
            in_specs=[
                pl.BlockSpec((tm, S), lambda i: (i, 0)),
                const((S, H)), const((1, H)),
                const((H, H)), const((1, H)),
                const((H, AP)), const((1, AP)),
            ],
            out_specs=pl.BlockSpec((tm, AP), lambda i: (i, 0)),
            compiler_params=pltpu.CompilerParams(
                dimension_semantics=("parallel",),
                vmem_limit_bytes=32 * 1024 * 1024),
            cost_estimate=cost,
        )(*args)

    if return_padded:
        return out            # [Bp, AP]; pad lanes are exact 0.0, pad rows junk
    return out[:B, :A]


# ----------------------------------------------------------------------------
# Reference / init (for the self-test)
# ----------------------------------------------------------------------------
def init_params(key, state_dim, action_dim, hidden=256):
    """Deterministic init mimicking nn.Linear's U(-1/sqrt(fan_in), +...)."""
    ks = jax.random.split(key, 6)

    def lin(kw, kb, fan_in, fan_out):
        bound = 1.0 / jnp.sqrt(fan_in)
        w = jax.random.uniform(kw, (fan_in, fan_out), jnp.float32, -bound, bound)
        b = jax.random.uniform(kb, (1, fan_out), jnp.float32, -bound, bound)
        return w, b

    w1, b1 = lin(ks[0], ks[1], state_dim, hidden)
    w2, b2 = lin(ks[2], ks[3], hidden, hidden)
    w3, b3 = lin(ks[4], ks[5], hidden, action_dim)
    return dict(w1=w1, b1=b1, w2=w2, b2=b2, w3=w3, b3=b3)


def reference_forward(x, p):
    h1 = jnp.maximum(x @ p["w1"] + p["b1"], 0.0)
    h2 = jnp.maximum(h1 @ p["w2"] + p["b2"], 0.0)
    logits = h2 @ p["w3"] + p["b3"]
    return jax.nn.softmax(logits, axis=-1)


if __name__ == "__main__":
    # Shapes consistent with the module: state_dim=32, action_dim=8,
    # hidden=256 (FCNBase default), batch=8.
    B, S, A, H = 8, 32, 8, 256

    key = jax.random.PRNGKey(0)
    kx, kx2, kp = jax.random.split(key, 3)
    x = jax.random.normal(kx, (B, S), dtype=jnp.float32)
    raw_params = init_params(kp, S, A, H)
    prepped = prepare_params(raw_params)      # one-time weight prep

    # Small batch -> grid-less single-tile path.
    out = jax.block_until_ready(policy_net_discrete_forward(x, prepped))
    ref = reference_forward(x, raw_params)
    assert out.shape == (B, A)
    o32 = out.astype(jnp.float32)
    assert jnp.allclose(jnp.sum(o32, axis=-1), 1.0, atol=1e-2)   # bf16 store
    assert jnp.allclose(o32, ref, atol=2e-2, rtol=1e-2)          # bf16 MXU

    # Larger, awkward batch -> balanced batch-tiled ("parallel") grid path.
    B2 = 2600
    x2 = jax.random.normal(kx2, (B2, S), dtype=jnp.float32)
    out2 = jax.block_until_ready(policy_net_discrete_forward(x2, prepped))
    ref2 = reference_forward(x2, raw_params)
    assert out2.shape == (B2, A)
    o2 = out2.astype(jnp.float32)
    assert jnp.allclose(jnp.sum(o2, axis=-1), 1.0, atol=1e-2)
    assert jnp.allclose(o2, ref2, atol=2e-2, rtol=1e-2)

    # TODO(synk): multi_action branch (list action_dim -> torch.split + per-chunk
    # softmax) not implemented; single-action branch only.
    print("KERNEL_OK")
</pallas_src>

<mosaic_0001>
module attributes {stable_mosaic.version = 11 : i64} {
  func.func @policy_net_kernel(%arg0: memref<8x32xf32, #tpu.memory_space<vmem>>, %arg1: memref<32x256xbf16, #tpu.memory_space<vmem>>, %arg2: memref<1x256xf32, #tpu.memory_space<vmem>>, %arg3: memref<256x256xbf16, #tpu.memory_space<vmem>>, %arg4: memref<1x256xf32, #tpu.memory_space<vmem>>, %arg5: memref<256x128xbf16, #tpu.memory_space<vmem>>, %arg6: memref<1x128xf32, #tpu.memory_space<vmem>>, %arg7: memref<8x128xbf16, #tpu.memory_space<vmem>>) attributes {dimension_semantics = [], scalar_prefetch = 0 : i64, scratch_operands = 0 : i64, tpu.core_type = #tpu.core_type<tc>} {
    %c0 = arith.constant 0 : index
    %c0_0 = arith.constant 0 : index
    %0 = vector.load %arg0[%c0, %c0_0] : memref<8x32xf32, #tpu.memory_space<vmem>>, vector<8x32xf32>
    %1 = arith.truncf %0 : vector<8x32xf32> to vector<8x32xbf16>
    %c0_1 = arith.constant 0 : index
    %c0_2 = arith.constant 0 : index
    %2 = vector.load %arg1[%c0_1, %c0_2] : memref<32x256xbf16, #tpu.memory_space<vmem>>, vector<32x256xbf16>
    %cst = arith.constant dense<0.000000e+00> : vector<8x256xf32>
    %3 = tpu.matmul %1, %2, %cst {dimension_numbers = #tpu.dot_dimension_numbers<[1], [0], [0], [1], [0, 0, 1, 1], [], []>} : vector<8x32xbf16>, vector<32x256xbf16>, vector<8x256xf32> -> vector<8x256xf32>
    %4 = arith.truncf %3 : vector<8x256xf32> to vector<8x256xbf16>
    %c0_3 = arith.constant 0 : index
    %c0_4 = arith.constant 0 : index
    %5 = vector.load %arg2[%c0_3, %c0_4] : memref<1x256xf32, #tpu.memory_space<vmem>>, vector<1x256xf32>
    %6 = arith.truncf %5 : vector<1x256xf32> to vector<1x256xbf16>
    %7 = vector.broadcast %6 : vector<1x256xbf16> to vector<8x256xbf16>
    %8 = arith.addf %4, %7 : vector<8x256xbf16>
    %cst_5 = arith.constant 0.000000e+00 : bf16
    %9 = vector.broadcast %cst_5 : bf16 to vector<8x256xbf16>
    %10 = arith.maximumf %8, %9 : vector<8x256xbf16>
    %c0_6 = arith.constant 0 : index
    %c0_7 = arith.constant 0 : index
    %11 = vector.load %arg3[%c0_6, %c0_7] : memref<256x256xbf16, #tpu.memory_space<vmem>>, vector<256x256xbf16>
    %cst_8 = arith.constant dense<0.000000e+00> : vector<8x256xf32>
    %12 = tpu.matmul %10, %11, %cst_8 {dimension_numbers = #tpu.dot_dimension_numbers<[1], [0], [0], [1], [0, 0, 1, 1], [], []>} : vector<8x256xbf16>, vector<256x256xbf16>, vector<8x256xf32> -> vector<8x256xf32>
    %13 = arith.truncf %12 : vector<8x256xf32> to vector<8x256xbf16>
    %c0_9 = arith.constant 0 : index
    %c0_10 = arith.constant 0 : index
    %14 = vector.load %arg4[%c0_9, %c0_10] : memref<1x256xf32, #tpu.memory_space<vmem>>, vector<1x256xf32>
    %15 = arith.truncf %14 : vector<1x256xf32> to vector<1x256xbf16>
    %16 = vector.broadcast %15 : vector<1x256xbf16> to vector<8x256xbf16>
    %17 = arith.addf %13, %16 : vector<8x256xbf16>
    %cst_11 = arith.constant 0.000000e+00 : bf16
    %18 = vector.broadcast %cst_11 : bf16 to vector<8x256xbf16>
    %19 = arith.maximumf %17, %18 : vector<8x256xbf16>
    %c0_12 = arith.constant 0 : index
    %c0_13 = arith.constant 0 : index
    %20 = vector.load %arg5[%c0_12, %c0_13] : memref<256x128xbf16, #tpu.memory_space<vmem>>, vector<256x128xbf16>
    %cst_14 = arith.constant dense<0.000000e+00> : vector<8x128xf32>
    %21 = tpu.matmul %19, %20, %cst_14 {dimension_numbers = #tpu.dot_dimension_numbers<[1], [0], [0], [1], [0, 0, 1, 1], [], []>} : vector<8x256xbf16>, vector<256x128xbf16>, vector<8x128xf32> -> vector<8x128xf32>
    %c0_15 = arith.constant 0 : index
    %c0_16 = arith.constant 0 : index
    %22 = vector.load %arg6[%c0_15, %c0_16] : memref<1x128xf32, #tpu.memory_space<vmem>>, vector<1x128xf32>
    %23 = vector.broadcast %22 : vector<1x128xf32> to vector<8x128xf32>
    %24 = arith.addf %21, %23 : vector<8x128xf32>
    %cst_17 = arith.constant dense<0xFF800000> : vector<8xf32>
    %25 = vector.multi_reduction <maximumf>, %24, %cst_17 [1] : vector<8x128xf32> to vector<8xf32>
    %26 = vector.shape_cast %25 : vector<8xf32> to vector<8x1xf32>
    %27 = vector.broadcast %26 : vector<8x1xf32> to vector<8x128xf32>
    %28 = arith.subf %24, %27 : vector<8x128xf32>
    %29 = math.exp %28 : vector<8x128xf32>
    %cst_18 = arith.constant dense<0.000000e+00> : vector<8xf32>
    %30 = vector.multi_reduction <add>, %29, %cst_18 [1] : vector<8x128xf32> to vector<8xf32>
    %31 = vector.shape_cast %30 : vector<8xf32> to vector<8x1xf32>
    %32 = vector.broadcast %31 : vector<8x1xf32> to vector<8x128xf32>
    %33 = arith.divf %29, %32 : vector<8x128xf32>
    %34 = arith.truncf %33 : vector<8x128xf32> to vector<8x128xbf16>
    %c0_19 = arith.constant 0 : index
    %c0_20 = arith.constant 0 : index
    %35 = vector.load %arg7[%c0_19, %c0_20] : memref<8x128xbf16, #tpu.memory_space<vmem>>, vector<8x128xbf16>
    tpu.vector_store %arg7[%c0_19, %c0_20], %34 {strides = array<i32>} : memref<8x128xbf16, #tpu.memory_space<vmem>>, vector<8x128xbf16>,
    return
  }
}

</mosaic_0001>

<bundles_post_ra>
// kernel: tpu_custom_call.1
= control target key start
LH: loop header
LB: loop body
LE: loop exit
PB: predicated region body
PF: predicated region fallthrough
CT: control target
= control target key end

     0   :  { %12 = vsyncpa [#allocation3], 0  ;;  %s1176_s0 = inlined_call_operand.hbm [shape: f32[8,32], index: 0, kind: input, shape index: {}]   ;;  %s1177_s1 = inlined_call_operand.hbm [shape: bf16[32,256], index: 1, kind: input, shape index: {}]   ;;  %s1178_s2 = inlined_call_operand.hbm [shape: f32[1,256], index: 2, kind: input, shape index: {}]   ;;  %s1179_s3 = inlined_call_operand.hbm [shape: bf16[256,256], index: 3, kind: input, shape index: {}]   ;;  %s1180_s4 = inlined_call_operand.vmem [shape: f32[1,256], index: 4, kind: input, shape index: {}]   ;;  %s1181_s5 = inlined_call_operand.hbm [shape: bf16[256,128], index: 5, kind: input, shape index: {}]   ;;  %s1182_s6 = inlined_call_operand.vmem [shape: f32[1,128], index: 6, kind: input, shape index: {}]   ;;  %s1183_s7 = inlined_call_operand.hbm [shape: bf16[8,128], index: 7, kind: output, shape index: {}]  }
   0x1   :  { %13 = vsyncpa [#allocation6], 0 }
   0x2   :  { %14 = vsyncpa [#allocation9], 0  ;;  %s31_s26 = sshll.u32 %s1177_s1, 4  ;;  %s32_s26 = int_to_ptr.hbm [resolvable:$true] %s31_s26 }
   0x3   :  { %15 = vsyncpa [#allocation4], 0  ;;  %s1100_s27 = smov [#allocation5]   ;;  %s55_s8 = sshll.u32 %s1179_s3, 4  ;;  %s56_s8 = int_to_ptr.hbm [resolvable:$true] %s55_s8 }
   0x4   :  { %s33_s28 = sshll.u32 %s1100_s27, 4  ;;  %s1101_s9 = smov 128   ;;  %s34_s28 = int_to_ptr.vmem [resolvable:$true] %s33_s28 }
   0x5   :  { %s1102_s10 = smov 8   ;;  %s1103_s11 = smov [#allocation8]  }
   0x6   :  { %39 = dma.hbm_to_vmem [thread:$0]  %s32_s26, 512, %s34_s28, [#allocation6], %s1101_s9, %s1101_s9, %s1102_s10  }
   0x7   :  { %s57_s12 = sshll.u32 %s1103_s11, 4  ;;  %s21_s15 = sshll.u32 %s1176_s0, 4  ;;  %s58_s12 = int_to_ptr.vmem [resolvable:$true] %s57_s12  ;;  %s22_s15 = int_to_ptr.hbm [resolvable:$true] %s21_s15 }
   0x8   :  { %63 = dma.hbm_to_vmem [thread:$0]  %s56_s8, 4096, %s58_s12, [#allocation9], %s1101_s9, %s1101_s9, %s1102_s10  }
   0x9   :  { %s45_s17 = sshll.u32 %s1178_s2, 4  ;;  %s1104_s18 = smov [#allocation2]   ;;  %s46_s17 = int_to_ptr.hbm [resolvable:$true] %s45_s17 }
   0xa   :  { %s23_s19 = sshll.u32 %s1104_s18, 4  ;;  %s1105_s3 = smov [#allocation7]   ;;  %s24_s19 = int_to_ptr.vmem [resolvable:$true] %s23_s19 }
   0xb   :  { %26 = dma.hbm_to_vmem [thread:$0]  %s22_s15, 128, %s24_s19, [#allocation3]  }
   0xc   :  { %s47_s20 = sshll.u32 %s1105_s3, 4  ;;  %s70_s23 = sshll.u32 %s1181_s5, 4  ;;  %s48_s20 = int_to_ptr.vmem [resolvable:$true] %s47_s20  ;;  %s71_s23 = int_to_ptr.hbm [resolvable:$true] %s70_s23 }
   0xd   :  { %50 = dma.hbm_to_vmem [thread:$0]  %s46_s17, 32, %s48_s20, [#allocation6]  }
   0xe   :  { %s1106_s0 = smov [#allocation10]   ;;  %s1107_s25 = smov 64  }
   0xf   :  { %s72_s24 = sshll.u32 %s1106_s0, 4  ;;  %s1108_s26 = smov 4   ;;  %s73_s24 = int_to_ptr.vmem [resolvable:$true] %s72_s24 }
  0x10   :  { %78 = dma.hbm_to_vmem [thread:$0]  %s71_s23, 2048, %s73_s24, [#allocation9], %s1107_s25, %s1107_s25, %s1108_s26  }
  0x11   :  { %1092 = dma.done.wait [#allocation3], 128  }
  0x12   :  { %1093 = vsyncadd [#allocation3], 4294967168 }
  0x13   :  { %1094 = dma.done.wait [#allocation6], 544  }
  0x14   :  { %1095 = vsyncadd [#allocation6], 4294966752 }
  0x15   :  { %1096 = dma.done.wait [#allocation9], 6144  }
  0x16   :  { %1097 = vsyncadd [#allocation9], 4294961152  ;;  %v681_v0 = vld [vmem:[#allocation5 + $0x10] sm:$0xf]  ;;  %v884_v1 = vld [vmem:[#allocation5 + $0x14] sm:$0xf0] }
  0x17   :  { %v883_v2 = vld [vmem:[#allocation5 + $0x14] sm:$0xf]  ;;  %v682_v3 = vor.u32 %v884_v1, %v681_v0  ;;  %v683_v4 = vld [vmem:[#allocation5 + $0x18] sm:$0xf0]  ;;  %v673_v5 = vld [vmem:[#allocation5] sm:$0xf] }
  0x18   :  { %v882_v6 = vld [vmem:[#allocation5 + $0x4] sm:$0xf0]  ;;  %v686_v7 = vor.u32 %v883_v2, %v683_v4  ;;  %v881_v8 = vld [vmem:[#allocation5 + $0x4] sm:$0xf]  ;;  %v675_v9 = vld [vmem:[#allocation5 + $0x8] sm:$0xf0] }
  0x19   :  { %v102_v10 = vld [vmem:[#allocation2] sm:$0xff]  ;;  %vm128_vm0 = vcmask 261120   ;;  %138 = vmatpush.bf16.msra.mxu0 %v682_v3  ;;  %v674_v11 = vor.u32 %v882_v6, %v673_v5  ;;  %v747_v12 = vld [vmem:[#allocation8 + $0x70] sm:$0xf]  ;;  %v678_v15 = vor.u32 %v881_v8, %v675_v9  ;;  %v739_v24 = vld [vmem:[#allocation8 + $0x60] sm:$0xf] }
  0x1a   :  { %v900_v13 = vld [vmem:[#allocation8 + $0x74] sm:$0xf0]  ;;  %v811_v14 = vld [vmem:[#allocation8 + $0xf0] sm:$0xf]  ;;  %151 = vmatpush.bf16.msra.mxu1 %v686_v7  ;;  %v899_v18 = vld [vmem:[#allocation8 + $0x74] sm:$0xf]  ;;  %v103_v25 = vpack.c.bf16 %v102_v10, %v102_v10 }
  0x1b   :  { %v748_v16 = vor.u32 %v900_v13, %v747_v12  ;;  %v916_v17 = vld [vmem:[#allocation8 + $0xf4] sm:$0xf0]  ;;  %v749_v19 = vld [vmem:[#allocation8 + $0x78] sm:$0xf0]  ;;  %v915_v22 = vld [vmem:[#allocation8 + $0xf4] sm:$0xf] }
  0x1c   :  { %v812_v20 = vor.u32 %v916_v17, %v811_v14  ;;  %v752_v21 = vor.u32 %v899_v18, %v749_v19  ;;  %v813_v23 = vld [vmem:[#allocation8 + $0xf8] sm:$0xf0]  ;;  %v898_v27 = vld [vmem:[#allocation8 + $0x64] sm:$0xf0]  ;;  %v803_v28 = vld [vmem:[#allocation8 + $0xe0] sm:$0xf] }
  0x1d   :  { %384 = vmatpush.bf16.msra.mxu2 %v748_v16  ;;  %v816_v26 = vor.u32 %v915_v22, %v813_v23  ;;  %v914_v29 = vld [vmem:[#allocation8 + $0xe4] sm:$0xf0]  ;;  %139 = vmatpush.bf16.msra.mxu0 %v674_v11  ;;  %v740_v30 = vor.u32 %v898_v27, %v739_v24  ;;  %v897_v32 = vld [vmem:[#allocation8 + $0x64] sm:$0xf]  ;;  %v741_v33 = vld [vmem:[#allocation8 + $0x68] sm:$0xf0] }
  0x1e   :  { %397 = vmatpush.bf16.msra.mxu3 %v812_v20  ;;  %v804_v31 = vor.u32 %v914_v29, %v803_v28  ;;  %v913_v34 = vld [vmem:[#allocation8 + $0xe4] sm:$0xf]  ;;  %152 = vmatpush.bf16.msra.mxu1 %v678_v15  ;;  %v744_v35 = vor.u32 %v897_v32, %v741_v33  ;;  %v805_v36 = vld [vmem:[#allocation8 + $0xe8] sm:$0xf0]  ;;  %v731_v37 = vld [vmem:[#allocation8 + $0x50] sm:$0xf] }
  0x1f   :  { %v896_v38 = vld [vmem:[#allocation8 + $0x54] sm:$0xf0]  ;;  %v808_v39 = vor.u32 %v913_v34, %v805_v36  ;;  %v795_v40 = vld [vmem:[#allocation8 + $0xd0] sm:$0xf]  ;;  %v895_v42 = vld [vmem:[#allocation8 + $0x54] sm:$0xf] }
  0x20   :  { %v912_v41 = vld [vmem:[#allocation8 + $0xd4] sm:$0xf0]  ;;  %687 = vmatmul.msk.bf16.vlgmr.msra.gmra.mxu0 %vm128_vm0, %v103_v25  ;;  %v732_v43 = vor.u32 %v896_v38, %v731_v37  ;;  %v733_v44 = vld [vmem:[#allocation8 + $0x58] sm:$0xf0]  ;;  %v911_v45 = vld [vmem:[#allocation8 + $0xd4] sm:$0xf] }
  0x21   :  { %410 = vmatpush.bf16.msrb.mxu0 %v752_v21  ;;  %385 = vmatpush.bf16.msra.mxu2 %v740_v30  ;;  %v797_v46 = vld [vmem:[#allocation8 + $0xd8] sm:$0xf0]  ;;  %v796_v47 = vor.u32 %v912_v41, %v795_v40  ;;  %v723_v48 = vld [vmem:[#allocation8 + $0x40] sm:$0xf]  ;;  %v894_v49 = vld [vmem:[#allocation8 + $0x44] sm:$0xf0]  ;;  %v736_v50 = vor.u32 %v895_v42, %v733_v44 }
  0x22   :  { %423 = vmatpush.bf16.msrb.mxu1 %v816_v26  ;;  %398 = vmatpush.bf16.msra.mxu3 %v804_v31  ;;  %v787_v51 = vld [vmem:[#allocation8 + $0xc0] sm:$0xf]  ;;  %v910_v52 = vld [vmem:[#allocation8 + $0xc4] sm:$0xf0]  ;;  %v800_v53 = vor.u32 %v911_v45, %v797_v46  ;;  %v893_v54 = vld [vmem:[#allocation8 + $0x44] sm:$0xf]  ;;  %v724_v56 = vor.u32 %v894_v49, %v723_v48 }
  0x23   :  { %688 = vmatmul.msk.bf16.vlgmr.msra.gmra.mxu1 %vm128_vm0, %v103_v25  ;;  %v725_v55 = vld [vmem:[#allocation8 + $0x48] sm:$0xf0]  ;;  %v909_v57 = vld [vmem:[#allocation8 + $0xc4] sm:$0xf]  ;;  %v788_v59 = vor.u32 %v910_v52, %v787_v51  ;;  %v715_v60 = vld [vmem:[#allocation8 + $0x30] sm:$0xf] }
  0x24   :  { %v789_v58 = vld [vmem:[#allocation8 + $0xc8] sm:$0xf0]  ;;  %v892_v61 = vld [vmem:[#allocation8 + $0x34] sm:$0xf0]  ;;  %v728_v62 = vor.u32 %v893_v54, %v725_v55  ;;  %v779_v63 = vld [vmem:[#allocation8 + $0xb0] sm:$0xf] }
  0x25   :  { %411 = vmatpush.bf16.msrb.mxu0 %v744_v35  ;;  %386 = vmatpush.bf16.msra.mxu2 %v732_v43  ;;  %v908_v0 = vld [vmem:[#allocation8 + $0xb4] sm:$0xf0]  ;;  %v792_v1 = vor.u32 %v909_v57, %v789_v58  ;;  %v891_v2 = vld [vmem:[#allocation8 + $0x34] sm:$0xf]  ;;  %v717_v3 = vld [vmem:[#allocation8 + $0x38] sm:$0xf0]  ;;  %v716_v4 = vor.u32 %v892_v61, %v715_v60 }
  0x26   :  { %424 = vmatpush.bf16.msrb.mxu1 %v808_v39  ;;  %399 = vmatpush.bf16.msra.mxu3 %v796_v47  ;;  %v907_v5 = vld [vmem:[#allocation8 + $0xb4] sm:$0xf]  ;;  %v781_v6 = vld [vmem:[#allocation8 + $0xb8] sm:$0xf0]  ;;  %v780_v7 = vor.u32 %v908_v0, %v779_v63  ;;  %v720_v8 = vor.u32 %v891_v2, %v717_v3  ;;  %v707_v10 = vld [vmem:[#allocation8 + $0x20] sm:$0xf] }
  0x27   :  { %v784_v9 = vor.u32 %v907_v5, %v781_v6  ;;  %v890_v11 = vld [vmem:[#allocation8 + $0x24] sm:$0xf0]  ;;  %v771_v12 = vld [vmem:[#allocation8 + $0xa0] sm:$0xf]  ;;  %v889_v15 = vld [vmem:[#allocation8 + $0x24] sm:$0xf] }
  0x28   :  { %v708_v13 = vor.u32 %v890_v11, %v707_v10  ;;  %v906_v14 = vld [vmem:[#allocation8 + $0xa4] sm:$0xf0]  ;;  %v709_v16 = vld [vmem:[#allocation8 + $0x28] sm:$0xf0]  ;;  %v905_v19 = vld [vmem:[#allocation8 + $0xa4] sm:$0xf] }
  0x29   :  { %412 = vmatpush.bf16.msrb.mxu0 %v736_v50  ;;  %387 = vmatpush.bf16.msra.mxu2 %v724_v56  ;;  %v772_v17 = vor.u32 %v906_v14, %v771_v12  ;;  %v712_v18 = vor.u32 %v889_v15, %v709_v16  ;;  %v773_v20 = vld [vmem:[#allocation8 + $0xa8] sm:$0xf0]  ;;  %v699_v22 = vld [vmem:[#allocation8 + $0x10] sm:$0xf]  ;;  %v888_v23 = vld [vmem:[#allocation8 + $0x14] sm:$0xf0] }
  0x2a   :  { %425 = vmatpush.bf16.msrb.mxu1 %v800_v53  ;;  %400 = vmatpush.bf16.msra.mxu3 %v788_v59  ;;  %v776_v21 = vor.u32 %v905_v19, %v773_v20  ;;  %v763_v24 = vld [vmem:[#allocation8 + $0x90] sm:$0xf]  ;;  %v700_v25 = vor.u32 %v888_v23, %v699_v22  ;;  %v904_v26 = vld [vmem:[#allocation8 + $0x94] sm:$0xf0]  ;;  %v887_v27 = vld [vmem:[#allocation8 + $0x14] sm:$0xf] }
  0x2b   :  { %v701_v28 = vld [vmem:[#allocation8 + $0x18] sm:$0xf0]  ;;  %v764_v29 = vor.u32 %v904_v26, %v763_v24  ;;  %v903_v31 = vld [vmem:[#allocation8 + $0x94] sm:$0xf]  ;;  %v691_v35 = vld [vmem:[#allocation8] sm:$0xf] }
  0x2c   :  { %v704_v30 = vor.u32 %v887_v27, %v701_v28  ;;  %v765_v32 = vld [vmem:[#allocation8 + $0x98] sm:$0xf0]  ;;  %v886_v36 = vld [vmem:[#allocation8 + $0x4] sm:$0xf0]  ;;  %v755_v37 = vld [vmem:[#allocation8 + $0x80] sm:$0xf] }
  0x2d   :  { %413 = vmatpush.bf16.msrb.mxu0 %v728_v62  ;;  %388 = vmatpush.bf16.msra.mxu2 %v716_v4  ;;  %v768_v33 = vor.u32 %v903_v31, %v765_v32  ;;  %v159_v34 = vld [vmem:[#allocation7] sm:$0x3]  ;;  %v692_v38 = vor.u32 %v886_v36, %v691_v35  ;;  %v902_v39 = vld [vmem:[#allocation8 + $0x84] sm:$0xf0]  ;;  %v885_v40 = vld [vmem:[#allocation8 + $0x4] sm:$0xf] }
  0x2e   :  { %426 = vmatpush.bf16.msrb.mxu1 %v792_v1  ;;  %401 = vmatpush.bf16.msra.mxu3 %v780_v7  ;;  %v693_v41 = vld [vmem:[#allocation8 + $0x8] sm:$0xf0]  ;;  %v756_v42 = vor.u32 %v902_v39, %v755_v37  ;;  %v901_v44 = vld [vmem:[#allocation8 + $0x84] sm:$0xf]  ;;  %v161_v47 = vperm.slane %v159_v34, 0  ;;  %v162_v48 = vperm.slane %v159_v34, 1 }
  0x2f   :  { %v696_v43 = vor.u32 %v885_v40, %v693_v41  ;;  %v757_v45 = vld [vmem:[#allocation8 + $0x88] sm:$0xf0]  ;;  %v924_v49 = vld [vmem:[#allocation10 + $0x38] sm:$0xff]  ;;  %v923_v52 = vld [vmem:[#allocation10 + $0x30] sm:$0xff]  ;;  %s659_s8 = sshll.u32 %s1183_s7, 4  ;;  %s660_s8 = int_to_ptr.hbm [resolvable:$true] %s659_s8 }
  0x30   :  { %v760_v46 = vor.u32 %v901_v44, %v757_v45  ;;  %v932_v50 = vld [vmem:[#allocation10 + $0x78] sm:$0xff]  ;;  %v165_v51 = vpack.c.bf16 %v162_v48, %v161_v47  ;;  %v931_v53 = vld [vmem:[#allocation10 + $0x70] sm:$0xff]  ;;  %v922_v56 = vld [vmem:[#allocation10 + $0x28] sm:$0xff] }
  0x31   :  { %414 = vmatpush.bf16.msrb.mxu0 %v720_v8  ;;  %389 = vmatpush.bf16.msra.mxu2 %v708_v13  ;;  %v930_v57 = vld [vmem:[#allocation10 + $0x68] sm:$0xff]  ;;  %v921_v15 = vld [vmem:[#allocation10 + $0x20] sm:$0xff]  ;;  %v919_v19 = vld [vmem:[#allocation10 + $0x10] sm:$0xff] }
  0x32   :  { %427 = vmatpush.bf16.msrb.mxu1 %v784_v9  ;;  %402 = vmatpush.bf16.msra.mxu3 %v772_v17  ;;  %v167_v54 = vunpack.c.l.b16 %v165_v51  ;;  %v168_v55 = vunpack.c.h.b16 %v165_v51  ;;  %v929_v16 = vld [vmem:[#allocation10 + $0x60] sm:$0xff]  ;;  %v920_v17 = vld [vmem:[#allocation10 + $0x18] sm:$0xff]  ;;  %v927_v20 = vld [vmem:[#allocation10 + $0x50] sm:$0xff] }
  0x33   :  { %v926_v22 = vld [vmem:[#allocation10 + $0x48] sm:$0xff]  ;;  %v917_v23 = vld [vmem:[#allocation10] sm:$0xff] }
  0x34   :  { %v169_v58 = vpack.c.b16 %v167_v54, %v167_v54  ;;  %v170_v59 = vpack.c.b16 %v168_v55, %v168_v55  ;;  %v925_v24 = vld [vmem:[#allocation10 + $0x40] sm:$0xff] }
  0x35   :  { %415 = vmatpush.bf16.msrb.mxu0 %v712_v18  ;;  %390 = vmatpush.bf16.msra.mxu2 %v700_v25  ;;  %v928_v18 = vld [vmem:[#allocation10 + $0x58] sm:$0xff]  ;;  %v437_v25 = vld [vmem:[%s1180_s4] sm:$0x3] }
  0x36   :  { %428 = vmatpush.bf16.msrb.mxu1 %v776_v21  ;;  %403 = vmatpush.bf16.msra.mxu3 %v764_v29  ;;  %v172_v60 = vpack.i.b16 %v169_v58, %v169_v58  ;;  %v176_v61 = vpack.i.b16 %v170_v59, %v170_v59  ;;  %v918_v21 = vld [vmem:[#allocation10 + $0x8] sm:$0xff]  ;;  %v439_v26 = vperm.slane %v437_v25, 0  ;;  %v440_v27 = vperm.slane %v437_v25, 1  ;;  %v943_v58 = vld [vmem:[%s1182_s6] ss:$0 sm:$0xff]  ;;  %s1109_s6 = smov [#allocation11]  }
  0x37   :  { %s657_s28 = sshll.u32 %s1109_s6, 4  ;;  %s658_s28 = int_to_ptr.vmem [resolvable:$true] %s657_s28 }
  0x38   :  { %v174_v62 = vperm.slane %v172_v60, 0  ;;  %v178_v63 = vperm.slane %v176_v61, 0  ;;  %v443_v28 = vpack.c.bf16 %v440_v27, %v439_v26 }
  0x39   :  { %416 = vmatpush.bf16.msrb.mxu0 %v704_v30  ;;  %391 = vmatpush.bf16.msra.mxu2 %v692_v38 }
  0x3a   :  { %429 = vmatpush.bf16.msrb.mxu1 %v768_v33  ;;  %404 = vmatpush.bf16.msra.mxu3 %v756_v42  ;;  %v181_v3 = vunpack.c.l.bf16 %v174_v62  ;;  %v182_v4 = vunpack.c.l.bf16 %v178_v63  ;;  %v445_v29 = vunpack.c.l.b16 %v443_v28  ;;  %v446_v30 = vunpack.c.h.b16 %v443_v28 }
  0x3c   :  { %v447_v31 = vpack.c.b16 %v445_v29, %v445_v29  ;;  %v448_v32 = vpack.c.b16 %v446_v30, %v446_v30 }
  0x3d   :  { %417 = vmatpush.bf16.msrb.mxu0 %v696_v43  ;;  %602 = vmatpush.bf16.msrb.mxu2 %v924_v49 }
  0x3e   :  { %430 = vmatpush.bf16.msrb.mxu1 %v760_v46  ;;  %615 = vmatpush.bf16.msrb.mxu3 %v932_v50  ;;  %v450_v35 = vpack.i.b16 %v447_v31, %v447_v31  ;;  %v454_v36 = vpack.i.b16 %v448_v32, %v448_v32 }
  0x40   :  { %v452_v37 = vperm.slane %v450_v35, 0  ;;  %v456_v38 = vperm.slane %v454_v36, 0 }
  0x41   :  { %603 = vmatpush.bf16.msrb.mxu2 %v923_v52 }
  0x42   :  { %616 = vmatpush.bf16.msrb.mxu3 %v931_v53  ;;  %v459_v46 = vunpack.c.l.bf16 %v452_v37  ;;  %v460_v47 = vunpack.c.l.bf16 %v456_v38 }
  0x45   :  { %604 = vmatpush.bf16.msrb.mxu2 %v922_v56 }
  0x46   :  { %617 = vmatpush.bf16.msrb.mxu3 %v930_v57 }
  0x49   :  { %605 = vmatpush.bf16.msrb.mxu2 %v921_v15 }
  0x4a   :  { %618 = vmatpush.bf16.msrb.mxu3 %v929_v16 }
  0x4d   :  { %606 = vmatpush.bf16.msrb.mxu2 %v920_v17 }
  0x4e   :  { %619 = vmatpush.bf16.msrb.mxu3 %v928_v18 }
  0x51   :  { %607 = vmatpush.bf16.msrb.mxu2 %v919_v19 }
  0x52   :  { %620 = vmatpush.bf16.msrb.mxu3 %v927_v20 }
  0x55   :  { %608 = vmatpush.bf16.msrb.mxu2 %v918_v21 }
  0x56   :  { %621 = vmatpush.bf16.msrb.mxu3 %v926_v22 }
  0x59   :  { %609 = vmatpush.bf16.msrb.mxu2 %v917_v23 }
  0x5a   :  { %622 = vmatpush.bf16.msrb.mxu3 %v925_v24 }
  0x9d   :  { %v141_v0 = vpop.f32.mrf.mxu0 }
  0xa0   :  { %v154_v1 = vpop.f32.mrf.mxu1 }
  0xa1   :  { %v158_v2 = vpack.c.bf16 %v154_v1, %v141_v0 }
  0xa3   :  { %v179_v5 = vunpack.c.l.bf16 %v158_v2  ;;  %v180_v6 = vunpack.c.h.bf16 %v158_v2 }
  0xa5   :  { %v183_v7 = vadd.f32 %v181_v3, %v179_v5  ;;  %v184_v8 = vadd.f32 %v182_v4, %v180_v6  ;;  %v143_v9 = vpop.f32.mrf.mxu0 }
  0xa7   :  { %v188_v10 = vmax.f32 %v183_v7, 0.0  ;;  %v189_v11 = vmax.f32 %v184_v8, 0.0 }
  0xa8   :  { %v156_v12 = vpop.f32.mrf.mxu1 }
  0xa9   :  { %v190_v13 = vpack.c.bf16 %v188_v10, %v188_v10  ;;  %v191_v14 = vpack.c.bf16 %v189_v11, %v189_v11 }
  0xab   :  { %392 = vmatmul.bf16.vlgmr.msra.gmra.mxu2 %v190_v13  ;;  %405 = vmatmul.bf16.vlgmr.msra.gmra.mxu3 %v191_v14 }
  0xac   :  { %418 = vmatmul.bf16.vlgmr.msrb.gmra.mxu0 %v190_v13  ;;  %431 = vmatmul.bf16.vlgmr.msrb.gmra.mxu1 %v191_v14 }
 0x129   :  { %v419_v33 = vpop.f32.mrf.mxu0  ;;  %v432_v34 = vpop.f32.mrf.mxu1 }
 0x12a   :  { %v433_v41 = vadd.f32 %v432_v34, %v419_v33 }
 0x12e   :  { %v393_v39 = vpop.f32.mrf.mxu2  ;;  %v406_v40 = vpop.f32.mrf.mxu3 }
 0x12f   :  { %v407_v42 = vadd.f32 %v406_v40, %v393_v39 }
 0x131   :  { %v436_v43 = vpack.c.bf16 %v433_v41, %v407_v42  ;;  %v421_v44 = vpop.f32.mrf.mxu0  ;;  %v434_v45 = vpop.f32.mrf.mxu1 }
 0x133   :  { %v457_v48 = vunpack.c.l.bf16 %v436_v43  ;;  %v458_v49 = vunpack.c.h.bf16 %v436_v43 }
 0x135   :  { %v461_v50 = vadd.f32 %v459_v46, %v457_v48  ;;  %v462_v51 = vadd.f32 %v460_v47, %v458_v49 }
 0x136   :  { %v395_v52 = vpop.f32.mrf.mxu2  ;;  %v408_v53 = vpop.f32.mrf.mxu3 }
 0x137   :  { %v466_v54 = vmax.f32 %v461_v50, 0.0  ;;  %v467_v55 = vmax.f32 %v462_v51, 0.0 }
 0x139   :  { %v468_v56 = vpack.c.bf16 %v466_v54, %v466_v54  ;;  %v469_v57 = vpack.c.bf16 %v467_v55, %v467_v55 }
 0x13b   :  { %610 = vmatmul.bf16.vlgmr.msrb.gmra.mxu2 %v468_v56  ;;  %623 = vmatmul.bf16.vlgmr.msrb.gmra.mxu3 %v469_v57 }
 0x1be   :  { %v611_v59 = vpop.f32.mrf.mxu2  ;;  %v624_v60 = vpop.f32.mrf.mxu3 }
 0x1bf   :  { %v612_v61 = vadd.f32 %v943_v58, %v611_v59 }
 0x1c1   :  { %v625_v62 = vadd.f32 %v624_v60, %v612_v61 }
 0x1c3   :  { %628 = vmax.xlane.f32.xlu0 %v625_v62 }
 0x1c6   :  { %v613_v63 = vpop.f32.mrf.mxu2  ;;  %v626_v0 = vpop.f32.mrf.mxu3 }
 0x236   :  { %v629_v1 = vpop.xlane.xlu0 %628 }
 0x237   :  { %v630_v2 = vsub.f32 %v625_v62, %v629_v1 }
 0x239   :  { %v631_v3 = vmul.f32 1.442695, %v630_v2 }
 0x23b   :  { %944 = vpow2.f32 %v631_v3 }
 0x241   :  { %v945_v4 = vpop.eup %944 }
 0x242   :  { %633 = vadd.xlane.f32.xlu0 %v945_v4 }
 0x2b5   :  { %v634_v5 = vpop.xlane.xlu0 %633 }
 0x2b6   :  { %946 = vrcp.f32 %v634_v5  ;;  %v646_v9 = vand.u32 2147483648, %v634_v5  ;;  %v644_v11 = vand.u32 2147483647, %v634_v5  ;;  %vm640_vm2 = vweird.f32 %v634_v5 }
 0x2b8   :  { %v647_v13 = vor.u32 1.1754944e-38, %v646_v9  ;;  %vm645_vm4 = vcmp.eq.f32.partialorder %v644_v11, 8.507059e+37 }
 0x2bc   :  { %v947_v6 = vpop.eup %946 }
 0x2bd   :  { %v636_v7 = vmul.f32 %v947_v6, %v634_v5  ;;  %vm641_vm1 = vweird.f32 %v947_v6 }
 0x2be   :  { %vm642_vm3 = vmor %vm640_vm2, %vm641_vm1 }
 0x2bf   :  { %v637_v8 = vsub.f32 1.0, %v636_v7 }
 0x2c1   :  { %v638_v10 = vmul.f32 %v947_v6, %v637_v8 }
 0x2c3   :  { %v639_v12 = vadd.f32 %v947_v6, %v638_v10 }
 0x2c5   :  { %v643_v14 = vsel %vm642_vm3, %v947_v6, %v639_v12 }
 0x2c6   :  { %v648_v15 = vsel %vm645_vm4, %v647_v13, %v643_v14 }
 0x2c7   :  { %v649_v16 = vmul.f32 %v945_v4, %v648_v15 }
 0x2c9   :  { %v650_v17 = vpack.c.bf16 %v649_v16, %v649_v16 }
 0x2cb   :  { %651 = vst [vmem:[#allocation11] sm:$0xf] %v650_v17 }
 0x2cc   :  { %662 = dma.vmem_to_hbm [thread:$0]  %s658_s28, 64, %s660_s8, [#allocation4]  }
 0x2cd   :  { %1098 = dma.done.wait [#allocation4], 64  }
 0x2ce   :  { %1099 = vsyncadd [#allocation4], 4294967232 }
 0x2cf   :  { %667 = vsyncpa [#allocation3], 1 }
 0x2d0   :  { %668 = vsyncpa [#allocation6], 1 }
 0x2d1   :  { %669 = vsyncpa [#allocation9], 1 }
 0x2d2   :  { %670 = vsyncpa [#allocation4], 1 }

</bundles_post_ra>
